<compile_context>
chip_gen: v7x
topology: tpu7x:2x2x1
jax: 0.10.0
libtpu: 0.0.40
codegen_flags: <defaults>
</compile_context>

<pallas_src>
import functools

import jax
import jax.numpy as jnp
from jax.experimental import pallas as pl
from jax.experimental.pallas import tpu as pltpu


def _film_kernel(x_ref, g_ref, b_ref, o_ref):
    # x_ref: (TM, TT)   g_ref/b_ref: (TM, 1)  (gamma+1 and beta, broadcast over T)
    # Single multiply-add per element on the hot streaming path.
    o_ref[...] = (x_ref[...] * g_ref[...] + b_ref[...]).astype(o_ref.dtype)


def _round_up(n, m):
    return ((n + m - 1) // m) * m


@functools.partial(jax.jit, static_argnames=("tm", "tt"))
def film_forward(x, r, wb, bb, wg, bg, *, tm=256, tt=1024):
    """FiLM forward.

    x : (B, C, T)      r : (B, Din)
    wb, wg : (C, Din)  (PyTorch nn.Linear weight layout)
    bb, bg : (C,)
    """
    B, C, T = x.shape

    # ---- beta / gamma projection: done once, fused, off the streaming path.
    # One matmul for both projections; fold the "+1" into gamma's bias.
    w = jnp.concatenate([wg, wb], axis=0)                           # (2C, Din)
    bias = jnp.concatenate([bg + 1.0, bb], axis=0)                  # (2C,)
    gb = (
        jnp.dot(r.astype(jnp.float32), w.astype(jnp.float32).T,
                preferred_element_type=jnp.float32)
        + bias
    )                                                               # (B, 2C)
    gamma1 = gb[:, :C]                                              # gamma + 1
    beta = gb[:, C:]

    # ---- streaming modulation over a flattened, lane-dense (B*C, T) view.
    BC = B * C
    x2 = x.reshape(BC, T)
    g2 = gamma1.reshape(BC, 1).astype(jnp.float32)
    b2 = beta.reshape(BC, 1).astype(jnp.float32)

    # Tile sizes: TM multiple of 8 (sublane), TT multiple of 128 (lane),
    # capped so tiny inputs don't over-pad.
    tm_eff = min(tm, _round_up(BC, 8))
    tt_eff = min(tt, _round_up(T, 128))
    BCp = _round_up(BC, tm_eff)
    Tp = _round_up(T, tt_eff)
    if BCp != BC or Tp != T:
        x2 = jnp.pad(x2, ((0, BCp - BC), (0, Tp - T)))
    if BCp != BC:
        g2 = jnp.pad(g2, ((0, BCp - BC), (0, 0)))
        b2 = jnp.pad(b2, ((0, BCp - BC), (0, 0)))

    grid = (BCp // tm_eff, Tp // tt_eff)

    out = pl.pallas_call(
        _film_kernel,
        out_shape=jax.ShapeDtypeStruct((BCp, Tp), x.dtype),
        grid=grid,
        in_specs=[
            pl.BlockSpec((tm_eff, tt_eff), lambda i, j: (i, j)),   # x tile
            pl.BlockSpec((tm_eff, 1), lambda i, j: (i, 0)),        # gamma + 1
            pl.BlockSpec((tm_eff, 1), lambda i, j: (i, 0)),        # beta
        ],
        out_specs=pl.BlockSpec((tm_eff, tt_eff), lambda i, j: (i, j)),
        compiler_params=pltpu.CompilerParams(
            # Independent tiles -> both axes parallel (v7x dual-TC sharding).
            dimension_semantics=("parallel", "parallel"),
        ),
        cost_estimate=pl.CostEstimate(
            flops=2 * BCp * Tp,
            transcendentals=0,
            bytes_accessed=2 * BCp * Tp * x.dtype.itemsize,
        ),
    )(x2, g2, b2)

    return out[:BC, :T].reshape(B, C, T)


def film_reference(x, r, wb, bb, wg, bg):
    beta = r @ wb.T + bb
    gamma = r @ wg.T + bg
    return x * (gamma + 1.0)[:, :, None] + beta[:, :, None]


if __name__ == "__main__":
    # Small shapes consistent with the module: r -> Linear(input_dim, output_dim),
    # x has output_dim channels and a trailing time axis.
    B, input_dim, output_dim, T = 2, 32, 8, 16

    key = jax.random.PRNGKey(0)
    k_x, k_r, k_wb, k_bb, k_wg, k_bg = jax.random.split(key, 6)

    x = jax.random.normal(k_x, (B, output_dim, T), dtype=jnp.float32)
    r = jax.random.normal(k_r, (B, input_dim), dtype=jnp.float32)

    # PyTorch Linear-style parameters: weight (out, in), bias (out,)
    bound = 1.0 / (input_dim ** 0.5)
    wb = jax.random.uniform(k_wb, (output_dim, input_dim), jnp.float32, -bound, bound)
    bb = jax.random.uniform(k_bb, (output_dim,), jnp.float32, -bound, bound)
    wg = jax.random.uniform(k_wg, (output_dim, input_dim), jnp.float32, -bound, bound)
    bg = jax.random.uniform(k_bg, (output_dim,), jnp.float32, -bound, bound)

    out = film_forward(x, r, wb, bb, wg, bg)
    out = jax.block_until_ready(out)

    ref = film_reference(x, r, wb, bb, wg, bg)
    assert out.shape == (B, output_dim, T)
    assert jnp.allclose(out, ref, atol=1e-5, rtol=1e-5)

    # NOTE: the PyTorch module's input_dim == 0 branch (identity) needs no
    # kernel; callers just return x.

    print("KERNEL_OK")
</pallas_src>

<mosaic_0001>
module attributes {stable_mosaic.version = 11 : i64} {
  func.func @_film_kernel(%arg0: i32, %arg1: i32, %arg2: memref<16x128xf32, #tpu.memory_space<vmem>>, %arg3: memref<16x1xf32, #tpu.memory_space<vmem>>, %arg4: memref<16x1xf32, #tpu.memory_space<vmem>>, %arg5: memref<16x128xf32, #tpu.memory_space<vmem>>) attributes {dimension_semantics = [#tpu.dimension_semantics<parallel>, #tpu.dimension_semantics<parallel>], iteration_bounds = array<i64: 1, 1>, scalar_prefetch = 0 : i64, scratch_operands = 0 : i64, tpu.core_type = #tpu.core_type<tc>, window_params = [{transform_indices = @transform_0, window_bounds = array<i64: 16, 128>}, {transform_indices = @transform_1, window_bounds = array<i64: 16, 1>}, {transform_indices = @transform_2, window_bounds = array<i64: 16, 1>}, {transform_indices = @transform_3, window_bounds = array<i64: 16, 128>}]} {
    %c0 = arith.constant 0 : index
    %c0_0 = arith.constant 0 : index
    %0 = vector.load %arg2[%c0, %c0_0] : memref<16x128xf32, #tpu.memory_space<vmem>>, vector<16x128xf32>
    %c0_1 = arith.constant 0 : index
    %c0_2 = arith.constant 0 : index
    %1 = vector.load %arg3[%c0_1, %c0_2] : memref<16x1xf32, #tpu.memory_space<vmem>>, vector<16x1xf32>
    %2 = vector.broadcast %1 : vector<16x1xf32> to vector<16x128xf32>
    %3 = arith.mulf %0, %2 : vector<16x128xf32>
    %c0_3 = arith.constant 0 : index
    %c0_4 = arith.constant 0 : index
    %4 = vector.load %arg4[%c0_3, %c0_4] : memref<16x1xf32, #tpu.memory_space<vmem>>, vector<16x1xf32>
    %5 = vector.broadcast %4 : vector<16x1xf32> to vector<16x128xf32>
    %6 = arith.addf %3, %5 : vector<16x128xf32>
    %c0_5 = arith.constant 0 : index
    %c0_6 = arith.constant 0 : index
    %7 = vector.load %arg5[%c0_5, %c0_6] : memref<16x128xf32, #tpu.memory_space<vmem>>, vector<16x128xf32>
    tpu.vector_store %arg5[%c0_5, %c0_6], %6 {strides = array<i32>} : memref<16x128xf32, #tpu.memory_space<vmem>>, vector<16x128xf32>,
    return
  }
  func.func @transform_0(%arg0: i32, %arg1: i32) -> (i32, i32) {
    %c0_i32 = arith.constant 0 : i32
    return %arg0, %arg1 : i32, i32
  }
  func.func @transform_1(%arg0: i32, %arg1: i32) -> (i32, i32) {
    %c0_i32 = arith.constant 0 : i32
    %c0_i32_0 = arith.constant 0 : i32
    return %arg0, %c0_i32 : i32, i32
  }
  func.func @transform_2(%arg0: i32, %arg1: i32) -> (i32, i32) {
    %c0_i32 = arith.constant 0 : i32
    %c0_i32_0 = arith.constant 0 : i32
    return %arg0, %c0_i32 : i32, i32
  }
  func.func @transform_3(%arg0: i32, %arg1: i32) -> (i32, i32) {
    %c0_i32 = arith.constant 0 : i32
    return %arg0, %arg1 : i32, i32
  }
}

</mosaic_0001>

<bundles_post_ra>
// kernel: film_forward.1
= control target key start
LH: loop header
LB: loop body
LE: loop exit
PB: predicated region body
PF: predicated region fallthrough
CT: control target
= control target key end

     0   :  { %v53_v0 = vmov 0   ;;  %s98_s2 = inlined_call_operand.vmem [shape: f32[16,1], index: 2, kind: input, shape index: {}]   ;;  %s99_s1 = inlined_call_operand.vmem [shape: f32[16,1], index: 1, kind: input, shape index: {}]   ;;  %s100_s0 = inlined_call_operand.vmem [shape: f32[16,128], index: 0, kind: input, shape index: {}]   ;;  %s101_s3 = inlined_call_operand.vmem [shape: f32[16,128], index: 3, kind: output, shape index: {}]  }
   0x1   :  { %52 = vset.pattern.permute.xlu1 %v53_v0  ;;  %51 = vset.pattern.permute.xlu0 %v53_v0  ;;  %v30_v1 = vld [vmem:[%s98_s2] sm:$0xff]  ;;  %v31_v3 = vld [vmem:[%s98_s2 + $0x8] sm:$0xff] }
   0x2   :  { %v16_v2 = vld [vmem:[%s99_s1] sm:$0xff]  ;;  %34 = vperm.xlu1 %52, %v30_v1   ;;  %v17_v4 = vld [vmem:[%s99_s1 + $0x8] sm:$0xff] }
   0x3   :  { %20 = vperm.xlu0 %51, %v16_v2   ;;  %v14_v5 = vld [vmem:[%s100_s0] sm:$0xff]  ;;  %v15_v9 = vld [vmem:[%s100_s0 + $0x8] sm:$0xff] }
   0x6   :  { %39 = vperm.xlu1 %52, %v31_v3  }
   0x7   :  { %25 = vperm.xlu0 %51, %v17_v4  }
  0x81   :  { %v35_v6 = vpop.permute.xlu1 %34 }
  0x82   :  { %v21_v7 = vpop.permute.xlu0 %20 }
  0x83   :  { %v28_v8 = vmul.f32 %v21_v7, %v14_v5 }
  0x85   :  { %v42_v10 = vadd.f32 %v35_v6, %v28_v8  ;;  %v40_v13 = vpop.permute.xlu1 %39 }
  0x86   :  { %v26_v11 = vpop.permute.xlu0 %25 }
  0x87   :  { %44 = vst [vmem:[%s101_s3] sm:$0xff] %v42_v10  ;;  %v29_v12 = vmul.f32 %v26_v11, %v15_v9 }
  0x89   :  { %v43_v14 = vadd.f32 %v40_v13, %v29_v12 }
  0x8b   :  { %45 = vst [vmem:[%s101_s3 + $0x8] sm:$0xff] %v43_v14 }

</bundles_post_ra>
